<compile_context>
chip_gen: v7x
topology: tpu7x:2x2x1
jax: 0.10.0
libtpu: 0.0.40
codegen_flags: <defaults>
</compile_context>

<pallas_src>
import jax
import jax.numpy as jnp
from jax import lax
from jax.experimental import pallas as pl
from jax.experimental.pallas import tpu as pltpu

NUM_CLASSES = 500
MAX_TILE_T = 1024      # <= 1024*500*4B = ~2 MiB per input buffer (f32)


def _make_ce_kernel(t_real, tile_t):
    """CE partial-sum kernel over grid (B, num_j).

    Output block (1, 128) is resident across the j (time-tile) axis for each
    b; every lane of the block ends up holding the per-b sum of
    (logsumexp(x_row) - x_row[target_b]) over valid rows.
    """

    def kernel(tgt_ref, x_ref, o_ref):
        # tgt_ref: (B,) int32 in SMEM (scalar prefetch)
        # x_ref:   (tile_t, 500) logits block (batch dim squeezed)
        # o_ref:   (1, 128) f32, resident across j for this b
        b = pl.program_id(0)
        j = pl.program_id(1)

        @pl.when(j == 0)
        def _init():
            o_ref[...] = jnp.zeros_like(o_ref)

        x = x_ref[...].astype(jnp.float32)                     # (tile_t, 500)
        t = tgt_ref[b]                                         # scalar label

        col = lax.broadcasted_iota(jnp.int32, x.shape, 1)      # class index
        row = lax.broadcasted_iota(jnp.int32, (tile_t, 1), 0) + j * tile_t
        valid = row < t_real                                   # mask ragged tail

        # Two per-row cross-lane reductions (max, sum-exp) + one for "picked".
        m = jnp.max(x, axis=-1, keepdims=True)                 # (tile_t, 1)
        s = jnp.sum(jnp.exp(x - m), axis=-1, keepdims=True)
        lse = m + jnp.log(s)                                   # (tile_t, 1)
        picked = jnp.sum(jnp.where(col == t, x, 0.0),
                         axis=-1, keepdims=True)               # (tile_t, 1)

        # where(), not multiply: undefined tail-row data (possibly inf/NaN)
        # must not poison the accumulator.
        row_loss = jnp.where(valid, lse - picked, 0.0)
        partial = jnp.sum(row_loss)                            # scalar
        o_ref[...] += partial                                  # vector add, all lanes

    return kernel


def _ce_loss_pallas(inp, target):
    B, T, C = inp.shape
    assert C == NUM_CLASSES

    # Tile the time axis.  For T <= MAX_TILE_T, use the full time dim as the
    # block (block dim == full array dim is always legal, no divisibility
    # requirement and no ragged tail).  For larger T, use 1024-row tiles
    # (multiple of 8 and 16 -> f32/bf16 sublane friendly); the last tile is
    # partial and masked in-kernel.
    tile_t = T if T <= MAX_TILE_T else MAX_TILE_T
    num_j = pl.cdiv(T, tile_t)

    itemsize = jnp.dtype(inp.dtype).itemsize
    cost = pl.CostEstimate(
        flops=6 * B * T * C,                  # max/sub/sum/compare/select/add
        transcendentals=B * T * (C + 1),      # exp per element + log per row
        bytes_accessed=B * T * C * itemsize + B * 128 * 4 + B * 4,
    )

    out = pl.pallas_call(
        _make_ce_kernel(T, tile_t),
        out_shape=jax.ShapeDtypeStruct((B, 1, 128), jnp.float32),
        grid_spec=pltpu.PrefetchScalarGridSpec(
            num_scalar_prefetch=1,
            grid=(B, num_j),
            in_specs=[pl.BlockSpec((None, tile_t, C),
                                   lambda b, j, tgt: (b, j, 0))],
            out_specs=pl.BlockSpec((None, 1, 128),
                                   lambda b, j, tgt: (b, 0, 0)),
        ),
        compiler_params=pltpu.CompilerParams(
            # b axis: independent per-b output blocks -> megacore-shardable.
            # j axis: reduction into the resident per-b block -> arbitrary.
            dimension_semantics=("parallel", "arbitrary"),
            vmem_limit_bytes=32 * 1024 * 1024,
        ),
        cost_estimate=cost,
    )(target.astype(jnp.int32), inp)

    # Every lane of out[b, 0, :] holds the per-b sum; take lane 0, finish the
    # mean in plain JAX.
    return jnp.sum(out[:, 0, 0]) / float(B * T)


def nll_sequence_loss(inp, target, dot=None, dot_labels=None):
    """Pallas equivalent of NLLSequenceLoss.forward.

    inp:        (B, T, 500) float logits (f32 or bf16; kept in native dtype)
    target:     (B,) int labels
    dot:        optional float array -> MSE(dot*125+125, dot_labels)
    dot_labels: optional float array, same shape as dot
    """
    loss = _ce_loss_pallas(inp, target)
    if dot is not None and dot_labels is not None:
        # Tiny elementwise mean: plain JAX (XLA fuses this; a separate
        # pallas_call would be pure launch overhead).
        d = dot.astype(jnp.float32) * 125.0 + 125.0 - dot_labels.astype(jnp.float32)
        loss = loss + jnp.mean(d * d)
    return loss


def _reference(inp, target, dot=None, dot_labels=None):
    B, T, C = inp.shape
    x = inp.reshape(B * T, C).astype(jnp.float32)
    t = jnp.broadcast_to(target[:, None], (B, T)).reshape(-1).astype(jnp.int32)
    lse = jax.nn.logsumexp(x, axis=-1)
    picked = jnp.take_along_axis(x, t[:, None], axis=-1)[:, 0]
    loss = jnp.mean(lse - picked)
    if dot is not None and dot_labels is not None:
        loss = loss + jnp.mean((dot.astype(jnp.float32) * 125.0 + 125.0
                                - dot_labels.astype(jnp.float32)) ** 2)
    return loss


if __name__ == "__main__":
    key = jax.random.PRNGKey(0)
    k1, k2, k3, k4, k5, k6 = jax.random.split(key, 6)

    # Case 1: main path, T a multiple of 8.
    B, T, C = 2, 8, NUM_CLASSES
    logits = jax.random.normal(k1, (B, T, C), dtype=jnp.float32)
    target = jax.random.randint(k2, (B,), 0, C, dtype=jnp.int32)
    loss = jax.block_until_ready(nll_sequence_loss(logits, target))
    ref = _reference(logits, target)
    assert jnp.allclose(loss, ref, rtol=1e-5, atol=1e-5), (loss, ref)

    # Case 2: ragged T (block dim == full, non-multiple-of-8 time axis).
    B2, T2 = 3, 11
    logits2 = jax.random.normal(k5, (B2, T2, C), dtype=jnp.float32)
    target2 = jax.random.randint(k6, (B2,), 0, C, dtype=jnp.int32)
    loss2 = jax.block_until_ready(nll_sequence_loss(logits2, target2))
    ref2 = _reference(logits2, target2)
    assert jnp.allclose(loss2, ref2, rtol=1e-5, atol=1e-5), (loss2, ref2)

    # Case 3: optional dot-regression (MSE) path.
    dot = jax.random.normal(k3, (B, 128), dtype=jnp.float32)
    dot_labels = jax.random.uniform(k4, (B, 128), dtype=jnp.float32) * 250.0
    loss3 = jax.block_until_ready(
        nll_sequence_loss(logits, target, dot=dot, dot_labels=dot_labels))
    ref3 = _reference(logits, target, dot=dot, dot_labels=dot_labels)
    assert jnp.allclose(loss3, ref3, rtol=1e-4, atol=1e-3), (loss3, ref3)

    print("KERNEL_OK")
</pallas_src>

<mosaic_0001>
module attributes {stable_mosaic.version = 11 : i64} {
  func.func @kernel(%arg0: i32, %arg1: i32, %arg2: memref<2xi32, #tpu.memory_space<smem>>, %arg3: memref<1x8x500xf32, #tpu.memory_space<vmem>>, %arg4: memref<1x1x128xf32, #tpu.memory_space<vmem>>) attributes {dimension_semantics = [#tpu.dimension_semantics<parallel>, #tpu.dimension_semantics<arbitrary>], iteration_bounds = array<i64: 2, 1>, scalar_prefetch = 1 : i64, scratch_operands = 0 : i64, tpu.core_type = #tpu.core_type<tc>, window_params = [{transform_indices = @transform_0, window_bounds = array<i64: 1, 8, 500>}, {transform_indices = @transform_1, window_bounds = array<i64: 1, 1, 128>}]} {
    %c0_i32 = arith.constant 0 : i32
    %0 = arith.cmpi eq, %arg1, %c0_i32 : i32
    %1 = arith.extui %0 : i1 to i32
    %c0_i32_0 = arith.constant 0 : i32
    %2 = arith.cmpi ne, %1, %c0_i32_0 : i32
    scf.if %2 {
      %cst_15 = arith.constant 0.000000e+00 : f32
      %43 = vector.broadcast %cst_15 : f32 to vector<1x128xf32>
      %c0_16 = arith.constant 0 : index
      %c0_17 = arith.constant 0 : index
      %c0_18 = arith.constant 0 : index
      %44 = vector.load %arg4[%c0_16, %c0_17, %c0_18] : memref<1x1x128xf32, #tpu.memory_space<vmem>>, vector<1x1x128xf32>
      %45 = vector.shape_cast %44 : vector<1x1x128xf32> to vector<1x128xf32>
      %46 = vector.shape_cast %43 : vector<1x128xf32> to vector<1x1x128xf32>
      tpu.vector_store %arg4[%c0_16, %c0_17, %c0_18], %46 {strides = array<i32>} : memref<1x1x128xf32, #tpu.memory_space<vmem>>, vector<1x1x128xf32>,
    } else {
    }
    %c0 = arith.constant 0 : index
    %c0_1 = arith.constant 0 : index
    %c0_2 = arith.constant 0 : index
    %3 = vector.load %arg3[%c0, %c0_1, %c0_2] : memref<1x8x500xf32, #tpu.memory_space<vmem>>, vector<1x8x500xf32>
    %4 = vector.shape_cast %3 : vector<1x8x500xf32> to vector<8x500xf32>
    %5 = arith.index_cast %arg0 : i32 to index
    %6 = memref.load %arg2[%5] : memref<2xi32, #tpu.memory_space<smem>>
    %7 = tpu.iota {dimensions = array<i32: 1>} : vector<8x500xi32>
    %8 = tpu.iota {dimensions = array<i32: 0>} : vector<8x1xi32>
    %c8_i32 = arith.constant 8 : i32
    %9 = arith.muli %arg1, %c8_i32 : i32
    %10 = vector.broadcast %9 : i32 to vector<8x1xi32>
    %11 = arith.addi %8, %10 : vector<8x1xi32>
    %c8_i32_3 = arith.constant 8 : i32
    %12 = vector.broadcast %c8_i32_3 : i32 to vector<8x1xi32>
    %13 = arith.cmpi slt, %11, %12 : vector<8x1xi32>
    %cst = arith.constant dense<0xFF800000> : vector<8xf32>
    %14 = vector.multi_reduction <maximumf>, %4, %cst [1] : vector<8x500xf32> to vector<8xf32>
    %15 = vector.shape_cast %14 : vector<8xf32> to vector<8x1xf32>
    %16 = vector.broadcast %15 : vector<8x1xf32> to vector<8x500xf32>
    %17 = arith.subf %4, %16 : vector<8x500xf32>
    %18 = math.exp %17 : vector<8x500xf32>
    %cst_4 = arith.constant dense<0.000000e+00> : vector<8xf32>
    %19 = vector.multi_reduction <add>, %18, %cst_4 [1] : vector<8x500xf32> to vector<8xf32>
    %20 = vector.shape_cast %19 : vector<8xf32> to vector<8x1xf32>
    %21 = math.log %20 : vector<8x1xf32>
    %22 = arith.addf %15, %21 : vector<8x1xf32>
    %23 = vector.broadcast %6 : i32 to vector<8x500xi32>
    %24 = arith.cmpi eq, %7, %23 : vector<8x500xi32>
    %cst_5 = arith.constant 0.000000e+00 : f32
    %25 = vector.broadcast %cst_5 : f32 to vector<8x500xf32>
    %26 = arith.select %24, %4, %25 : vector<8x500xi1>, vector<8x500xf32>
    %cst_6 = arith.constant dense<0.000000e+00> : vector<8xf32>
    %27 = vector.multi_reduction <add>, %26, %cst_6 [1] : vector<8x500xf32> to vector<8xf32>
    %28 = vector.shape_cast %27 : vector<8xf32> to vector<8x1xf32>
    %29 = arith.subf %22, %28 : vector<8x1xf32>
    %cst_7 = arith.constant 0.000000e+00 : f32
    %30 = vector.broadcast %cst_7 : f32 to vector<8x1xf32>
    %31 = arith.select %13, %29, %30 : vector<8x1xi1>, vector<8x1xf32>
    %32 = vector.shape_cast %31 : vector<8x1xf32> to vector<1x8x1xf32>
    %cst_8 = arith.constant dense<0.000000e+00> : vector<1xf32>
    %33 = vector.multi_reduction <add>, %32, %cst_8 [1, 2] : vector<1x8x1xf32> to vector<1xf32>
    %34 = vector.shape_cast %33 : vector<1xf32> to vector<1x1x1xf32>
    %35 = vector.extract %34[0, 0, 0] : f32 from vector<1x1x1xf32>
    %c0_9 = arith.constant 0 : index
    %c0_10 = arith.constant 0 : index
    %c0_11 = arith.constant 0 : index
    %36 = vector.load %arg4[%c0_9, %c0_10, %c0_11] : memref<1x1x128xf32, #tpu.memory_space<vmem>>, vector<1x1x128xf32>
    %37 = vector.shape_cast %36 : vector<1x1x128xf32> to vector<1x128xf32>
    %38 = vector.broadcast %35 : f32 to vector<1x128xf32>
    %39 = arith.addf %37, %38 : vector<1x128xf32>
    %c0_12 = arith.constant 0 : index
    %c0_13 = arith.constant 0 : index
    %c0_14 = arith.constant 0 : index
    %40 = vector.load %arg4[%c0_12, %c0_13, %c0_14] : memref<1x1x128xf32, #tpu.memory_space<vmem>>, vector<1x1x128xf32>
    %41 = vector.shape_cast %40 : vector<1x1x128xf32> to vector<1x128xf32>
    %42 = vector.shape_cast %39 : vector<1x128xf32> to vector<1x1x128xf32>
    tpu.vector_store %arg4[%c0_12, %c0_13, %c0_14], %42 {strides = array<i32>} : memref<1x1x128xf32, #tpu.memory_space<vmem>>, vector<1x1x128xf32>,
    return
  }
  func.func @transform_0(%arg0: i32, %arg1: i32, %arg2: memref<2xi32, #tpu.memory_space<smem>>) -> (i32, i32, i32) {
    %c0_i32 = arith.constant 0 : i32
    %c0_i32_0 = arith.constant 0 : i32
    return %arg0, %arg1, %c0_i32 : i32, i32, i32
  }
  func.func @transform_1(%arg0: i32, %arg1: i32, %arg2: memref<2xi32, #tpu.memory_space<smem>>) -> (i32, i32, i32) {
    %c0_i32 = arith.constant 0 : i32
    %c0_i32_0 = arith.constant 0 : i32
    %c0_i32_1 = arith.constant 0 : i32
    return %arg0, %c0_i32, %c0_i32_0 : i32, i32, i32
  }
}

</mosaic_0001>

<bundles_post_ra>
// kernel: tpu_custom_call.1
= control target key start
LH: loop header
LB: loop body
LE: loop exit
PB: predicated region body
PF: predicated region fallthrough
CT: control target
= control target key end

     0   :  { %s747_s0 = inlined_call_operand.hbm [shape: s32[2], index: 0, kind: input, shape index: {}]   ;;  %s748_s1 = inlined_call_operand.hbm [shape: f32[2,8,500], index: 1, kind: input, shape index: {}]   ;;  %s749_s2 = inlined_call_operand.hbm [shape: f32[2,1,128], index: 2, kind: output, shape index: {}]  }
   0x1   :  { %s413_s11 = scalar_lea.hbm %s747_s0, 16 }
   0x2   :  { %p414_p0 = scmp.ne.s32.totalorder %s747_s0, %s413_s11  ;;  %p417_p1 = scmp.lt.u32.totalorder %s413_s11, %s747_s0 }
   0x4   :  { %p419_p2 = pnand %p417_p1, %p414_p0 }
   0x6   :  { %422 = shalt.err (!%p419_p2)  }
   0x7   :  { %s539_s16 = smov [#allocation3]  }
   0x8   :  { %8 = dma.hbm_to_smem %s747_s0, 16, %s539_s16, [#allocation2] }
   0x9   :  { %505 = dma.done.wait [#allocation2], 16 }
   0xa   :  { %506 = vsyncadd [#allocation2], 4294967280 }
   0xb   :  { %10 = sfence }
   0xc   :  { %11 = vsyncpa [#allocation5], 0 }
   0xd   :  { %13 = vsyncpa [#allocation5 + $0x1], 0 }
   0xe   :  { %14 = vsyncpa [#allocation6], 0 }
   0xf   :  { %16 = vsyncpa [#allocation6 + $0x1], 0  ;;  %s570_s19 = smov 0   ;;  %s572_s20 = smov 0  }
  0x10   :  { %s574_s21 = smov 0   ;;  %s576_s22 = smov 0  }
  0x11   :  { %s578_s23 = smov 0   ;;  %s580_s24 = smov 0  }
  0x12 LB: > { %s324_s0 = sadd.s32 4294967295, %s537_s24   ;;  %s325_s25 = sadd.s32 4294967294, %s537_s24   ;;  %s537_s24 = sphi %s580_s24, %s22_s24   ;;  %s533_s23 = sphi %s578_s23, %s765_s23   ;;  %s529_s22 = sphi %s576_s22, %s764_s22   ;;  %s525_s21 = sphi %s574_s21, %s763_s21   ;;  %s521_s20 = sphi %s572_s20, %s762_s20   ;;  %s517_s19 = sphi %s570_s19, %s761_s19  }
  0x13   : > { %s34_s26 = sadd.s32 1, %s533_s23  ;;  %s43_s27 = sadd.s32 1, %s525_s21 }
  0x14   : > { %p36_p3 = scmp.ge.s32.totalorder %s34_s26, 2  ;;  %p50_p4 = scmp.ne.s32.totalorder %s525_s21, %s521_s20 }
  0x15   : > { %p51_p5 = scmp.eq.s32.totalorder %s537_s24, 0  ;;  %p56_p6 = scmp.ne.s32.totalorder %s521_s20, %s517_s19 }
  0x16   : > { %s767_s26 = smov (%p36_p3, %s34_s26), 0  ;;  %p57_p8 = scmp.eq.s32.totalorder %s324_s0, 0 }
  0x17   : > { %p611_p7 = por %p51_p5, %p50_p4  ;;  %s38_s29 = ssub.s32 %s533_s23, %s767_s26 }
  0x18   : > { %p80_p9 = scmp.eq.s32.totalorder %s324_s0, 1  ;;  %p41_p10 = scmp.eq.s32.totalorder %s38_s29, 0 }
  0x19   : > { %p617_p11 = por %p57_p8, %p56_p6  ;;  %p86_p13 = scmp.eq.s32.totalorder %s325_s25, 1 }
  0x1a   : > { %p621_p12 = por %p80_p9, %p50_p4  ;;  %p351_p2 = scmp.lt.s32.totalorder %s537_s24, 2 }
  0x1b   : > { %s626_s4 = scalar_select %p41_p10, %s525_s21, %s43_s27  }
  0x1c   : > { %s753_s3 = scalar_select %p621_p12, 1, 0 }
  0x1d   : > { %p628_p0 = por %p86_p13, %p56_p6  ;;  %s106_s6 = sand.u32 1, %s525_s21  }
  0x1e   : > { %s328_s7 = sshll.u32 %s106_s6, 5  ;;  %s336_s8 = sshll.u32 %s533_s23, 9 }
  0x1f   : > { %s754_s5 = scalar_select %p628_p0, 1, 0 }
  0x20   : > { %s639_s11 = scalar_lea.hbm %s748_s1, %s336_s8  ;;  %s110_s12 = scalar_lea.vmem [#allocation4], %s328_s7 }
  0x21   : > { %s120_s13 = sshll.u32 %s110_s12, 4  ;;  %p645_p3 = pnand %p351_p2, %p611_p7  ;;  %s641_s13 = int_to_ptr.vmem [resolvable:$true] %s120_s13 }
  0x22   : > { %s107_s15 = scalar_lea.sflag [#allocation5], %s106_s6  ;;  %s423_s16 = scalar_lea.hbm %s639_s11, 512 }
  0x23   : > { %p424_p6 = scmp.ne.s32.totalorder %s639_s11, %s423_s16  ;;  %p425_p8 = pneg %p645_p3 }
  0x24   : > { %s428_s0 = scalar_lea.hbm %s748_s1, 1024  ;;  %p429_p7 = scmp.lt.u32.totalorder %s639_s11, %s748_s1 }
  0x25   : > { %p426_p9 = pnand %p425_p8, %p424_p6  ;;  %p430_p13 = scmp.lt.u32.totalorder %s428_s0, %s423_s16 }
  0x26   : > { %p432_p1 = scmp.lt.u32.totalorder %s423_s16, %s639_s11 }
  0x27   : > { %p427_p10 = pneg %p426_p9  ;;  %p431_p2 = por %p430_p13, %p429_p7 }
  0x29   : > { %p433_p4 = por %p432_p1, %p431_p2 }
  0x2b   : > { %p434_p5 = pnand %p433_p4, %p427_p10 }
  0x2d   : > { %437 = shalt.err (!%p434_p5)
}
  0x2e   : > { %s438_s28 = scalar_lea.vmem %s641_s13, 512  ;;  %s540_s29 = smov [#allocation4]  }
  0x2f   : > { %p439_p6 = scmp.ne.s32.totalorder %s641_s13, %s438_s28  ;;  %s443_s6 = sshll.u32 %s540_s29, 4  ;;  %s444_s6 = int_to_ptr.vmem [resolvable:$false] %s443_s6 }
  0x30   : > { %s445_s7 = scalar_lea.vmem %s444_s6, 1024  ;;  %p446_p12 = scmp.lt.s32.totalorder %s641_s13, %s444_s6 }
  0x31   : > { %p441_p9 = pnand %p439_p6, %p425_p8  ;;  %p447_p7 = scmp.lt.s32.totalorder %s445_s7, %s438_s28 }
  0x33   : > { %p442_p0 = pneg %p441_p9  ;;  %p448_p13 = por %p447_p7, %p446_p12 }
  0x35   : > { %p449_p1 = pnand %p448_p13, %p442_p0 }
  0x37   : > { %452 = shalt.err (!%p449_p1)
}
  0x38   : > { %346 = dma.hbm_to_vmem [thread:$0]  (!%p645_p3), %s639_s11, 512, %s641_s13, %s107_s15  }
  0x39   : > { %p756_p4 = scmp.lt.s32.totalorder %s537_s24, 3  ;;  %p757_p5 = scmp.ge.s32.totalorder %s537_s24, 1 }
  0x3b   : > { %p126_p8 = pnand %p757_p5, %p756_p4 }
  0x3c   : > { %s681_s8 = sand.u32 (!%p126_p8), 1, %s521_s20  }
  0x3d   : > { %129 = sbr.rel (%p126_p8) target bundleno = 621 (0x26d), region = 24  ;;  %s332_s9 = sshll.u32 (!%p126_p8), %s681_s8, 5 }
  0x3e   : > { %s132_s10 = scalar_lea.sflag (!%p126_p8), [#allocation5], %s681_s8  ;;  %s135_s12 = scalar_lea.vmem (!%p126_p8), [#allocation4], %s332_s9 }
  0x44   : > { %508 = dma.done.wait (%p617_p11), %s132_s10, 512  }
  0x45   : > { %510 = vsyncadd (%p617_p11), %s132_s10, 4294966784  ;;  %vm174_vm0 = vcmask 949248   ;;  %v158_v0 = vld [vmem:[%s135_s12] sm:$0xff]  ;;  %v159_v1 = vld [vmem:[%s135_s12 + $0x8] sm:$0xff]  ;;  %s162_s11 = sld [smem:[#allocation3 + %s529_s22]]  ;;  %v163_v8 = vlaneseq  ;;  %vm219_vm5 = vcmask 7168  }
  0x46   : > { %v160_v2 = vld [vmem:[%s135_s12 + $0x10] sm:$0xff]  ;;  %v161_v3 = vld [vmem:[%s135_s12 + $0x18] sm:$0xff]  ;;  %v176_v4 = vmax.f32 %v158_v0, %v159_v1  ;;  %s152_s30 = scalar_lea.vmem [#allocation7], %s681_s8  ;;  %v541_v46 = vmov 0.0   ;;  %s333_s13 = sshll.u32 %s529_s22, 4 }
  0x47   : > { %v175_v5 = vsel %vm174_vm0, %v161_v3, -inf  ;;  %v164_v9 = vand.u32 127, %v163_v8  ;;  %157 = vst [vmem:[%s152_s30] sm:$0x1] %v541_v46  ;;  %s247_s14 = sshll.u32 %s152_s30, 4  ;;  %s698_s18 = scalar_lea.hbm %s749_s2, %s333_s13  ;;  %s700_s14 = int_to_ptr.vmem [resolvable:$true] %s247_s14 }
  0x48   : > { %v177_v6 = vmax.f32 %v160_v2, %v175_v5  ;;  %s235_s0 = scalar_lea.sflag [#allocation6], %s681_s8  ;;  %s453_s25 = scalar_lea.vmem %s700_s14, 16 }
  0x49   : > { %v165_v10 = vadd.s32 128, %v164_v9  ;;  %v166_v11 = vadd.s32 256, %v164_v9  ;;  %v167_v12 = vadd.s32 384, %v164_v9  ;;  %p454_p11 = scmp.ne.s32.totalorder %s700_s14, %s453_s25  ;;  %p758_p12 = scmp.ne.s32.totalorder %s753_s3, 0 }
  0x4a   : > { %v178_v7 = vmax.f32 %v176_v4, %v177_v6  ;;  %s542_s22 = smov [#allocation7]  }
  0x4b   : > { %v202_v13 = vstv %s162_s11  ;;  %p455_p0 = pnand %p454_p11, %p758_p12  ;;  %s457_s27 = sshll.u32 %s542_s22, 4  ;;  %s458_s27 = int_to_ptr.vmem [resolvable:$false] %s457_s27 }
  0x4c   : > { %179 = vmax.xlane.f32.xlu0 %v178_v7  ;;  %vm203_vm1 = vcmp.eq.s32.totalorder %v164_v9, %v202_v13  ;;  %vm204_vm2 = vcmp.eq.s32.totalorder %v165_v10, %v202_v13  ;;  %vm205_vm3 = vcmp.eq.s32.totalorder %v166_v11, %v202_v13  ;;  %vm206_vm4 = vcmp.eq.s32.totalorder %v167_v12, %v202_v13  ;;  %s459_s28 = scalar_lea.vmem %s458_s27, 32  ;;  %p460_p10 = scmp.lt.s32.totalorder %s700_s14, %s458_s27 }
  0x4d   : > { %v207_v14 = vsel %vm203_vm1, %v158_v0, 0.0  ;;  %v208_v15 = vsel %vm204_vm2, %v159_v1, 0.0  ;;  %v209_v16 = vsel %vm205_vm3, %v160_v2, 0.0  ;;  %v210_v17 = vsel %vm206_vm4, %v161_v3, 0.0  ;;  %p456_p3 = pneg %p455_p0  ;;  %p461_p2 = scmp.lt.s32.totalorder %s459_s28, %s453_s25 }
  0x4e   : > { %v211_v18 = vadd.f32 %v208_v15, %v207_v14  ;;  %v213_v19 = vsel %vm174_vm0, %v210_v17, 0.0  ;;  %v230_v54 = vld [vmem:[%s152_s30] sm:$0x1] }
  0x4f   : > { %p462_p6 = por %p461_p2, %p460_p10 }
  0x50   : > { %v212_v20 = vadd.f32 %v211_v18, %v209_v16 }
  0x51   : > { %p463_p9 = pnand %p462_p6, %p456_p3 }
  0x52   : > { %v214_v21 = vadd.f32 %v213_v19, %v212_v20 }
  0x54   : > { %215 = vadd.xlane.f32.xlu1 %v214_v21 }
  0xd9   : > { %v180_v22 = vpop.xlane.xlu0 %179 }
  0xda   : > { %v181_v23 = vsub.f32 %v158_v0, %v180_v22  ;;  %v182_v24 = vsub.f32 %v159_v1, %v180_v22  ;;  %v183_v25 = vsub.f32 %v160_v2, %v180_v22  ;;  %v184_v26 = vsub.f32 %v161_v3, %v180_v22 }
  0xdc   : > { %v185_v27 = vmul.f32 1.442695, %v181_v23  ;;  %v187_v28 = vmul.f32 1.442695, %v182_v24  ;;  %v189_v29 = vmul.f32 1.442695, %v183_v25 }
  0xdd   : > { %v191_v30 = vmul.f32 1.442695, %v184_v26 }
  0xde   : > { %403 = vpow2.f32 %v185_v27 }
  0xdf   : > { %405 = vpow2.f32 %v187_v28 }
  0xe0   : > { %407 = vpow2.f32 %v189_v29 }
  0xe1   : > { %409 = vpow2.f32 %v191_v30  ;;  %v216_v42 = vpop.xlane.xlu1 %215 }
  0xe8   : > { %v404_v31 = vpop.eup %403 }
  0xe9   : > { %v406_v32 = vpop.eup %405 }
  0xea   : > { %v408_v33 = vpop.eup %407  ;;  %v193_v34 = vadd.f32 %v406_v32, %v404_v31 }
  0xeb   : > { %v410_v35 = vpop.eup %409 }
  0xec   : > { %v194_v36 = vadd.f32 %v408_v33, %v193_v34  ;;  %v195_v37 = vsel %vm174_vm0, %v410_v35, 0.0 }
  0xee   : > { %v196_v38 = vadd.f32 %v195_v37, %v194_v36 }
  0xf0   : > { %197 = vadd.xlane.f32.xlu0 %v196_v38 }
 0x17d   : > { %v198_v39 = vpop.xlane.xlu0 %197 }
 0x17e   : > { %411 = vlog2.f32 %v198_v39 }
 0x188   : > { %v412_v40 = vpop.eup %411 }
 0x189   : > { %v200_v41 = vmul.f32 0.6931472, %v412_v40 }
 0x18b   : > { %v201_v43 = vadd.f32 %v200_v41, %v180_v22 }
 0x18d   : > { %v217_v44 = vsub.f32 %v201_v43, %v216_v42 }
 0x18f   : > { %v220_v45 = vsel %vm219_vm5, %v217_v44, 0.0 }
 0x190   : > { %221 = vadd.xlane.f32.xlu1 %v220_v45 }
 0x21d   : > { %v222_v47 = vpop.xlane.xlu1 %221 }
 0x21e   : > { %v223_v48 = vrot.slane %v222_v47, 4 }
 0x220   : > { %v224_v49 = vadd.f32 %v223_v48, %v222_v47 }
 0x222   : > { %v225_v50 = vrot.slane %v224_v49, 2 }
 0x224   : > { %v226_v51 = vadd.f32 %v225_v50, %v224_v49 }
 0x226   : > { %v227_v52 = vrot.slane %v226_v51, 1 }
 0x228   : > { %v228_v53 = vadd.f32 %v227_v52, %v226_v51 }
 0x22a   : > { %337 = vpush %v228_v53 }
 0x25b   : > { %s338_s15 = spop %337 }
 0x25c   : > { %v231_v55 = vstv %s338_s15 }
 0x25d   : > { %v232_v56 = vadd.f32 %v231_v55, %v230_v54 }
 0x25f   : > { %233 = vst [vmem:[%s152_s30] sm:$0x1] %v232_v56 }
 0x260   : > { %466 = shalt.err (!%p463_p9)
}
 0x261   : > { %s467_s29 = scalar_lea.hbm %s698_s18, 16  ;;  %s471_s8 = scalar_lea.hbm %s749_s2, 32 }
 0x262   : > { %p468_p7 = scmp.ne.s32.totalorder %s698_s18, %s467_s29  ;;  %p472_p4 = scmp.lt.u32.totalorder %s698_s18, %s749_s2 }
 0x263   : > { %p473_p5 = scmp.lt.u32.totalorder %s471_s8, %s467_s29  ;;  %p475_p11 = scmp.lt.u32.totalorder %s467_s29, %s698_s18 }
 0x264   : > { %p469_p13 = pnand %p468_p7, %p758_p12 }
 0x265   : > { %p474_p8 = por %p473_p5, %p472_p4 }
 0x266   : > { %p470_p1 = pneg %p469_p13 }
 0x267   : > { %p476_p0 = por %p475_p11, %p474_p8 }
 0x269   : > { %p477_p3 = pnand %p476_p0, %p470_p1 }
 0x26b   : > { %480 = shalt.err (!%p477_p3)
}
 0x26c   : > { %341 = dma.vmem_to_hbm [thread:$0]  (%p758_p12), %s700_s14, 16, %s698_s18, %s235_s0  }
 0x26d PF: > { %s259_s12 = sand.u32 1, %s517_s19   ;;  %p759_p10 = scmp.ne.s32.totalorder %s754_s5, 0 }
 0x26e   : > { %p760_p2 = scmp.ge.s32.totalorder %s537_s24, 2  ;;  %s260_s11 = scalar_lea.sflag [#allocation6], %s259_s12 }
 0x270   : > { %p348_p6 = pnand %p760_p2, %p759_p10 }
 0x272   : > { %512 = dma.done.wait (!%p348_p6), %s260_s11, 16  }
 0x273   : > { %514 = vsyncadd (!%p348_p6), %s260_s11, 4294967280  ;;  %s22_s24 = sadd.s32 1, %s537_s24   ;;  %s761_s19 = smov %s521_s20 }
 0x274   : > { %p19_p9 = scmp.ge.s32.totalorder %s22_s24, 4   ;;  %s762_s20 = smov %s525_s21 }
 0x275   : > { %s763_s21 = smov %s626_s4  ;;  %s764_s22 = smov %s533_s23 }
 0x276   : > { %s765_s23 = smov %s767_s26  ;;  %21 = sbr.rel (!%p19_p9) target bundleno = 18 (0x12), region = 73 }
 0x27d   :  { %264 = vsyncpa [#allocation5], 1 }
 0x27e   :  { %266 = vsyncpa [#allocation5 + $0x1], 1 }
 0x27f   :  { %267 = vsyncpa [#allocation6], 1 }
 0x280   :  { %269 = vsyncpa [#allocation6 + $0x1], 1 }

</bundles_post_ra>
